<compile_context>
chip_gen: v5e
topology: v5e:2x2
jax: 0.10.0
libtpu: 0.0.40
codegen_flags: <defaults>
</compile_context>

<pallas_src>
import jax
import jax.numpy as jnp
from jax.experimental import pallas as pl
from jax.experimental.pallas import tpu as pltpu


def _lstm_classifier_kernel(x_ref, wih_ref, whh_ref, b_ref,
                            wout_ref, bout_ref, out_ref, hs_ref):
    # x_ref:    (T, D)   bf16
    # wih_ref:  (D, 4H)  bf16  = W_ih^T   (PyTorch gate order i, f, g, o)
    # whh_ref:  (H, 4H)  bf16  = W_hh^T
    # b_ref:    (1, 4H)  f32   = b_ih + b_hh
    # wout_ref: (H, C)   f32   = W_out^T
    # bout_ref: (1, C)   f32
    # out_ref:  (C, T)   f32   log-softmax scores, transposed (torch.t)
    # hs_ref:   (T, H)   f32   VMEM scratch holding all hidden states
    T = x_ref.shape[0]
    H = whh_ref.shape[0]

    # Hoisted input projection: pre_gates[t] = x[t] @ W_ih^T + (b_ih + b_hh), all t.
    pre_gates = (jnp.dot(x_ref[...], wih_ref[...],
                         preferred_element_type=jnp.float32)
                 + b_ref[...])                              # (T, 4H) f32

    whh = whh_ref[...]                                      # (H, 4H) bf16, loop-invariant

    # Hoisted lane mask: lanes [2H, 3H) are the "g" gate (tanh); the rest use sigmoid.
    lane = jax.lax.broadcasted_iota(jnp.int32, (1, 4 * H), 1)
    is_g = jnp.logical_and(lane >= 2 * H, lane < 3 * H)

    h = jnp.zeros((1, H), jnp.float32)
    c = jnp.zeros((1, H), jnp.float32)

    # Fully unrolled recurrence (T is a small, static trip count).
    for t in range(T):
        gates = (jnp.dot(h.astype(jnp.bfloat16), whh,
                         preferred_element_type=jnp.float32)
                 + pre_gates[t:t + 1, :])                   # (1, 4H) f32
        # Two full-vreg EUP launches + one VPU select instead of 4 small launches.
        act = jnp.where(is_g, jnp.tanh(gates), jax.nn.sigmoid(gates))
        i_g = act[:, 0 * H:1 * H]
        f_g = act[:, 1 * H:2 * H]
        g_g = act[:, 2 * H:3 * H]
        o_g = act[:, 3 * H:4 * H]
        c = f_g * c + i_g * g_g
        h = o_g * jnp.tanh(c)
        hs_ref[pl.ds(t, 1), :] = h

    # hidden2tag: (T, H) @ (H, C) + b  -> (T, C)
    logits = jnp.dot(hs_ref[...], wout_ref[...],
                     preferred_element_type=jnp.float32) + bout_ref[...]

    # LogSoftmax over dim=1 (class axis), numerically stable.
    m = jnp.max(logits, axis=1, keepdims=True)
    lse = jnp.log(jnp.sum(jnp.exp(logits - m), axis=1, keepdims=True)) + m
    log_scores = logits - lse                               # (T, C)

    # torch.t(scores) -> (C, T)
    out_ref[...] = log_scores.T


def lstm_classifier_forward(sequence, params):
    """sequence: (T, D) float32. Returns (C, T) log-softmax scores."""
    T, D = sequence.shape
    w_ih, w_hh, b_ih, b_hh, w_out, b_out = (
        params["w_ih"], params["w_hh"], params["b_ih"],
        params["b_hh"], params["w_out"], params["b_out"])
    H = w_hh.shape[1]
    C = w_out.shape[0]

    # Glue: pre-transpose weights; bf16 for MXU operands, f32 elsewhere.
    x_bf16 = sequence.astype(jnp.bfloat16)                     # (T, D)
    wih_t = jnp.transpose(w_ih).astype(jnp.bfloat16)            # (D, 4H)
    whh_t = jnp.transpose(w_hh).astype(jnp.bfloat16)            # (H, 4H)
    b = (b_ih + b_hh)[None, :].astype(jnp.float32)              # (1, 4H)
    wout_t = jnp.transpose(w_out).astype(jnp.float32)           # (H, C)
    bout = b_out[None, :].astype(jnp.float32)                   # (1, C)

    vmem_spec = pl.BlockSpec(memory_space=pltpu.MemorySpace.VMEM)

    flops = 2 * T * D * 4 * H + 2 * T * H * 4 * H + 2 * T * H * C
    transcendentals = T * (2 * 4 * H + H) + 2 * T * C
    bytes_accessed = (2 * (T * D + D * 4 * H + H * 4 * H)
                      + 4 * (4 * H + H * C + C + C * T))

    # TODO(synk): if T ever grows large, tile x / hidden states over a 1-D grid on T
    # (double-buffered BlockSpecs) and re-derive the tile budget for v7x's 64 MiB VMEM.
    return pl.pallas_call(
        _lstm_classifier_kernel,
        out_shape=jax.ShapeDtypeStruct((C, T), jnp.float32),
        in_specs=[vmem_spec] * 6,
        out_specs=vmem_spec,
        scratch_shapes=[pltpu.VMEM((T, H), jnp.float32)],
        compiler_params=pltpu.CompilerParams(
            vmem_limit_bytes=32 * 1024 * 1024),
        cost_estimate=pl.CostEstimate(
            flops=flops,
            transcendentals=transcendentals,
            bytes_accessed=bytes_accessed),
    )(x_bf16, wih_t, whh_t, b, wout_t, bout)


def _lstm_classifier_ref(sequence, params):
    """Plain-JAX reference matching the kernel's bf16 matmul / f32 elementwise scheme."""
    w_ih, w_hh, b_ih, b_hh, w_out, b_out = (
        params["w_ih"], params["w_hh"], params["b_ih"],
        params["b_hh"], params["w_out"], params["b_out"])
    T = sequence.shape[0]
    H = w_hh.shape[1]
    x = sequence.astype(jnp.bfloat16)
    wih_t = jnp.transpose(w_ih).astype(jnp.bfloat16)
    whh_t = jnp.transpose(w_hh).astype(jnp.bfloat16)
    b = (b_ih + b_hh)[None, :].astype(jnp.float32)
    pre = jnp.dot(x, wih_t, preferred_element_type=jnp.float32) + b
    h = jnp.zeros((1, H), jnp.float32)
    c = jnp.zeros((1, H), jnp.float32)
    hs = []
    for t in range(T):
        gates = (jnp.dot(h.astype(jnp.bfloat16), whh_t,
                         preferred_element_type=jnp.float32) + pre[t:t + 1, :])
        i_g = jax.nn.sigmoid(gates[:, 0 * H:1 * H])
        f_g = jax.nn.sigmoid(gates[:, 1 * H:2 * H])
        g_g = jnp.tanh(gates[:, 2 * H:3 * H])
        o_g = jax.nn.sigmoid(gates[:, 3 * H:4 * H])
        c = f_g * c + i_g * g_g
        h = o_g * jnp.tanh(c)
        hs.append(h)
    hs = jnp.concatenate(hs, axis=0)
    logits = jnp.dot(hs, jnp.transpose(w_out),
                     preferred_element_type=jnp.float32) + b_out[None, :]
    return jax.nn.log_softmax(logits, axis=1).T


def init_params(key, input_dim, hidden_dim, target_dim):
    """Deterministic init mimicking nn.LSTM / nn.Linear shapes (uniform +-1/sqrt(H))."""
    ks = jax.random.split(key, 6)
    bound = 1.0 / jnp.sqrt(jnp.float32(hidden_dim))
    u = lambda k, shape: jax.random.uniform(k, shape, jnp.float32, -bound, bound)
    return {
        "w_ih": u(ks[0], (4 * hidden_dim, input_dim)),
        "w_hh": u(ks[1], (4 * hidden_dim, hidden_dim)),
        "b_ih": u(ks[2], (4 * hidden_dim,)),
        "b_hh": u(ks[3], (4 * hidden_dim,)),
        "w_out": u(ks[4], (target_dim, hidden_dim)),
        "b_out": u(ks[5], (target_dim,)),
    }


if __name__ == "__main__":
    T, D, H, C = 8, 16, 32, 8   # seq_len, input_dim, hidden_dim, target_dim

    key = jax.random.PRNGKey(0)
    k_x, k_p = jax.random.split(key)
    sequence = jax.random.normal(k_x, (T, D), jnp.float32)
    params = init_params(k_p, D, H, C)

    scores = lstm_classifier_forward(sequence, params)   # (C, T)
    jax.block_until_ready(scores)

    assert scores.shape == (C, T)
    # log-softmax sanity: exp(scores) sums to ~1 over the class axis (axis 0 after transpose)
    assert jnp.allclose(jnp.sum(jnp.exp(scores), axis=0), 1.0, atol=1e-4)
    # numerical check against a plain-JAX reference with matching precision scheme
    ref = _lstm_classifier_ref(sequence, params)
    assert jnp.allclose(scores, ref, atol=1e-3, rtol=1e-3)

    print("KERNEL_OK")
</pallas_src>

<mosaic_0001>
module attributes {stable_mosaic.version = 11 : i64} {
  func.func @_lstm_classifier_kernel(%arg0: memref<8x16xbf16, #tpu.memory_space<vmem>>, %arg1: memref<16x128xbf16, #tpu.memory_space<vmem>>, %arg2: memref<32x128xbf16, #tpu.memory_space<vmem>>, %arg3: memref<1x128xf32, #tpu.memory_space<vmem>>, %arg4: memref<32x8xf32, #tpu.memory_space<vmem>>, %arg5: memref<1x8xf32, #tpu.memory_space<vmem>>, %arg6: memref<8x8xf32, #tpu.memory_space<vmem>>, %arg7: memref<8x32xf32, #tpu.memory_space<vmem>>) attributes {dimension_semantics = [], scalar_prefetch = 0 : i64, scratch_operands = 1 : i64, tpu.core_type = #tpu.core_type<tc>} {
    %c0 = arith.constant 0 : index
    %c0_0 = arith.constant 0 : index
    %0 = vector.load %arg0[%c0, %c0_0] : memref<8x16xbf16, #tpu.memory_space<vmem>>, vector<8x16xbf16>
    %c0_1 = arith.constant 0 : index
    %c0_2 = arith.constant 0 : index
    %1 = vector.load %arg1[%c0_1, %c0_2] : memref<16x128xbf16, #tpu.memory_space<vmem>>, vector<16x128xbf16>
    %cst = arith.constant dense<0.000000e+00> : vector<8x128xf32>
    %2 = tpu.matmul %0, %1, %cst {dimension_numbers = #tpu.dot_dimension_numbers<[1], [0], [0], [1], [0, 0, 1, 1], [], []>} : vector<8x16xbf16>, vector<16x128xbf16>, vector<8x128xf32> -> vector<8x128xf32>
    %c0_3 = arith.constant 0 : index
    %c0_4 = arith.constant 0 : index
    %3 = vector.load %arg3[%c0_3, %c0_4] : memref<1x128xf32, #tpu.memory_space<vmem>>, vector<1x128xf32>
    %4 = vector.broadcast %3 : vector<1x128xf32> to vector<8x128xf32>
    %5 = arith.addf %2, %4 : vector<8x128xf32>
    %c0_5 = arith.constant 0 : index
    %c0_6 = arith.constant 0 : index
    %6 = vector.load %arg2[%c0_5, %c0_6] : memref<32x128xbf16, #tpu.memory_space<vmem>>, vector<32x128xbf16>
    %7 = tpu.iota {dimensions = array<i32: 1>} : vector<1x128xi32>
    %c64_i32 = arith.constant 64 : i32
    %8 = vector.broadcast %c64_i32 : i32 to vector<1x128xi32>
    %9 = arith.cmpi sge, %7, %8 : vector<1x128xi32>
    %c96_i32 = arith.constant 96 : i32
    %10 = vector.broadcast %c96_i32 : i32 to vector<1x128xi32>
    %11 = arith.cmpi slt, %7, %10 : vector<1x128xi32>
    %12 = arith.andi %9, %11 : vector<1x128xi1>
    %cst_7 = arith.constant 0.000000e+00 : f32
    %13 = vector.broadcast %cst_7 : f32 to vector<1x32xf32>
    %cst_8 = arith.constant 0.000000e+00 : f32
    %14 = vector.broadcast %cst_8 : f32 to vector<1x32xf32>
    %15 = arith.truncf %13 : vector<1x32xf32> to vector<1x32xbf16>
    %cst_9 = arith.constant dense<0.000000e+00> : vector<1x128xf32>
    %16 = tpu.matmul %15, %6, %cst_9 {dimension_numbers = #tpu.dot_dimension_numbers<[1], [0], [0], [1], [0, 0, 1, 1], [], []>} : vector<1x32xbf16>, vector<32x128xbf16>, vector<1x128xf32> -> vector<1x128xf32>
    %17 = vector.extract_strided_slice %5 {offsets = [0, 0], sizes = [1, 128], strides = [1, 1]} : vector<8x128xf32> to vector<1x128xf32>
    %18 = arith.addf %16, %17 : vector<1x128xf32>
    %19 = math.tanh %18 : vector<1x128xf32>
    %20 = arith.negf %18 : vector<1x128xf32>
    %21 = math.exp %20 : vector<1x128xf32>
    %cst_10 = arith.constant 1.000000e+00 : f32
    %22 = vector.broadcast %cst_10 : f32 to vector<1x128xf32>
    %23 = arith.addf %22, %21 : vector<1x128xf32>
    %24 = arith.divf %22, %23 : vector<1x128xf32>
    %25 = arith.select %12, %19, %24 : vector<1x128xi1>, vector<1x128xf32>
    %26 = vector.extract_strided_slice %25 {offsets = [0, 0], sizes = [1, 32], strides = [1, 1]} : vector<1x128xf32> to vector<1x32xf32>
    %27 = vector.extract_strided_slice %25 {offsets = [0, 32], sizes = [1, 32], strides = [1, 1]} : vector<1x128xf32> to vector<1x32xf32>
    %28 = vector.extract_strided_slice %25 {offsets = [0, 64], sizes = [1, 32], strides = [1, 1]} : vector<1x128xf32> to vector<1x32xf32>
    %29 = vector.extract_strided_slice %25 {offsets = [0, 96], sizes = [1, 32], strides = [1, 1]} : vector<1x128xf32> to vector<1x32xf32>
    %30 = arith.mulf %27, %14 : vector<1x32xf32>
    %31 = arith.mulf %26, %28 : vector<1x32xf32>
    %32 = arith.addf %30, %31 : vector<1x32xf32>
    %33 = math.tanh %32 : vector<1x32xf32>
    %34 = arith.mulf %29, %33 : vector<1x32xf32>
    %c0_11 = arith.constant 0 : index
    %c0_12 = arith.constant 0 : index
    %35 = vector.load %arg7[%c0_11, %c0_12] : memref<8x32xf32, #tpu.memory_space<vmem>>, vector<1x32xf32>
    tpu.vector_store %arg7[%c0_11, %c0_12], %34 {strides = array<i32>} : memref<8x32xf32, #tpu.memory_space<vmem>>, vector<1x32xf32>,
    %36 = arith.truncf %34 : vector<1x32xf32> to vector<1x32xbf16>
    %cst_13 = arith.constant dense<0.000000e+00> : vector<1x128xf32>
    %37 = tpu.matmul %36, %6, %cst_13 {dimension_numbers = #tpu.dot_dimension_numbers<[1], [0], [0], [1], [0, 0, 1, 1], [], []>} : vector<1x32xbf16>, vector<32x128xbf16>, vector<1x128xf32> -> vector<1x128xf32>
    %38 = vector.extract_strided_slice %5 {offsets = [1, 0], sizes = [1, 128], strides = [1, 1]} : vector<8x128xf32> to vector<1x128xf32>
    %39 = arith.addf %37, %38 : vector<1x128xf32>
    %40 = math.tanh %39 : vector<1x128xf32>
    %41 = arith.negf %39 : vector<1x128xf32>
    %42 = math.exp %41 : vector<1x128xf32>
    %cst_14 = arith.constant 1.000000e+00 : f32
    %43 = vector.broadcast %cst_14 : f32 to vector<1x128xf32>
    %44 = arith.addf %43, %42 : vector<1x128xf32>
    %45 = arith.divf %43, %44 : vector<1x128xf32>
    %46 = arith.select %12, %40, %45 : vector<1x128xi1>, vector<1x128xf32>
    %47 = vector.extract_strided_slice %46 {offsets = [0, 0], sizes = [1, 32], strides = [1, 1]} : vector<1x128xf32> to vector<1x32xf32>
    %48 = vector.extract_strided_slice %46 {offsets = [0, 32], sizes = [1, 32], strides = [1, 1]} : vector<1x128xf32> to vector<1x32xf32>
    %49 = vector.extract_strided_slice %46 {offsets = [0, 64], sizes = [1, 32], strides = [1, 1]} : vector<1x128xf32> to vector<1x32xf32>
    %50 = vector.extract_strided_slice %46 {offsets = [0, 96], sizes = [1, 32], strides = [1, 1]} : vector<1x128xf32> to vector<1x32xf32>
    %51 = arith.mulf %48, %32 : vector<1x32xf32>
    %52 = arith.mulf %47, %49 : vector<1x32xf32>
    %53 = arith.addf %51, %52 : vector<1x32xf32>
    %54 = math.tanh %53 : vector<1x32xf32>
    %55 = arith.mulf %50, %54 : vector<1x32xf32>
    %c1 = arith.constant 1 : index
    %c0_15 = arith.constant 0 : index
    %56 = vector.load %arg7[%c1, %c0_15] : memref<8x32xf32, #tpu.memory_space<vmem>>, vector<1x32xf32>
    tpu.vector_store %arg7[%c1, %c0_15], %55 {strides = array<i32>} : memref<8x32xf32, #tpu.memory_space<vmem>>, vector<1x32xf32>,
    %57 = arith.truncf %55 : vector<1x32xf32> to vector<1x32xbf16>
    %cst_16 = arith.constant dense<0.000000e+00> : vector<1x128xf32>
    %58 = tpu.matmul %57, %6, %cst_16 {dimension_numbers = #tpu.dot_dimension_numbers<[1], [0], [0], [1], [0, 0, 1, 1], [], []>} : vector<1x32xbf16>, vector<32x128xbf16>, vector<1x128xf32> -> vector<1x128xf32>
    %59 = vector.extract_strided_slice %5 {offsets = [2, 0], sizes = [1, 128], strides = [1, 1]} : vector<8x128xf32> to vector<1x128xf32>
    %60 = arith.addf %58, %59 : vector<1x128xf32>
    %61 = math.tanh %60 : vector<1x128xf32>
    %62 = arith.negf %60 : vector<1x128xf32>
    %63 = math.exp %62 : vector<1x128xf32>
    %cst_17 = arith.constant 1.000000e+00 : f32
    %64 = vector.broadcast %cst_17 : f32 to vector<1x128xf32>
    %65 = arith.addf %64, %63 : vector<1x128xf32>
    %66 = arith.divf %64, %65 : vector<1x128xf32>
    %67 = arith.select %12, %61, %66 : vector<1x128xi1>, vector<1x128xf32>
    %68 = vector.extract_strided_slice %67 {offsets = [0, 0], sizes = [1, 32], strides = [1, 1]} : vector<1x128xf32> to vector<1x32xf32>
    %69 = vector.extract_strided_slice %67 {offsets = [0, 32], sizes = [1, 32], strides = [1, 1]} : vector<1x128xf32> to vector<1x32xf32>
    %70 = vector.extract_strided_slice %67 {offsets = [0, 64], sizes = [1, 32], strides = [1, 1]} : vector<1x128xf32> to vector<1x32xf32>
    %71 = vector.extract_strided_slice %67 {offsets = [0, 96], sizes = [1, 32], strides = [1, 1]} : vector<1x128xf32> to vector<1x32xf32>
    %72 = arith.mulf %69, %53 : vector<1x32xf32>
    %73 = arith.mulf %68, %70 : vector<1x32xf32>
    %74 = arith.addf %72, %73 : vector<1x32xf32>
    %75 = math.tanh %74 : vector<1x32xf32>
    %76 = arith.mulf %71, %75 : vector<1x32xf32>
    %c2 = arith.constant 2 : index
    %c0_18 = arith.constant 0 : index
    %77 = vector.load %arg7[%c2, %c0_18] : memref<8x32xf32, #tpu.memory_space<vmem>>, vector<1x32xf32>
    tpu.vector_store %arg7[%c2, %c0_18], %76 {strides = array<i32>} : memref<8x32xf32, #tpu.memory_space<vmem>>, vector<1x32xf32>,
    %78 = arith.truncf %76 : vector<1x32xf32> to vector<1x32xbf16>
    %cst_19 = arith.constant dense<0.000000e+00> : vector<1x128xf32>
    %79 = tpu.matmul %78, %6, %cst_19 {dimension_numbers = #tpu.dot_dimension_numbers<[1], [0], [0], [1], [0, 0, 1, 1], [], []>} : vector<1x32xbf16>, vector<32x128xbf16>, vector<1x128xf32> -> vector<1x128xf32>
    %80 = vector.extract_strided_slice %5 {offsets = [3, 0], sizes = [1, 128], strides = [1, 1]} : vector<8x128xf32> to vector<1x128xf32>
    %81 = arith.addf %79, %80 : vector<1x128xf32>
    %82 = math.tanh %81 : vector<1x128xf32>
    %83 = arith.negf %81 : vector<1x128xf32>
    %84 = math.exp %83 : vector<1x128xf32>
    %cst_20 = arith.constant 1.000000e+00 : f32
    %85 = vector.broadcast %cst_20 : f32 to vector<1x128xf32>
    %86 = arith.addf %85, %84 : vector<1x128xf32>
    %87 = arith.divf %85, %86 : vector<1x128xf32>
    %88 = arith.select %12, %82, %87 : vector<1x128xi1>, vector<1x128xf32>
    %89 = vector.extract_strided_slice %88 {offsets = [0, 0], sizes = [1, 32], strides = [1, 1]} : vector<1x128xf32> to vector<1x32xf32>
    %90 = vector.extract_strided_slice %88 {offsets = [0, 32], sizes = [1, 32], strides = [1, 1]} : vector<1x128xf32> to vector<1x32xf32>
    %91 = vector.extract_strided_slice %88 {offsets = [0, 64], sizes = [1, 32], strides = [1, 1]} : vector<1x128xf32> to vector<1x32xf32>
    %92 = vector.extract_strided_slice %88 {offsets = [0, 96], sizes = [1, 32], strides = [1, 1]} : vector<1x128xf32> to vector<1x32xf32>
    %93 = arith.mulf %90, %74 : vector<1x32xf32>
    %94 = arith.mulf %89, %91 : vector<1x32xf32>
    %95 = arith.addf %93, %94 : vector<1x32xf32>
    %96 = math.tanh %95 : vector<1x32xf32>
    %97 = arith.mulf %92, %96 : vector<1x32xf32>
    %c3 = arith.constant 3 : index
    %c0_21 = arith.constant 0 : index
    %98 = vector.load %arg7[%c3, %c0_21] : memref<8x32xf32, #tpu.memory_space<vmem>>, vector<1x32xf32>
    tpu.vector_store %arg7[%c3, %c0_21], %97 {strides = array<i32>} : memref<8x32xf32, #tpu.memory_space<vmem>>, vector<1x32xf32>,
    %99 = arith.truncf %97 : vector<1x32xf32> to vector<1x32xbf16>
    %cst_22 = arith.constant dense<0.000000e+00> : vector<1x128xf32>
    %100 = tpu.matmul %99, %6, %cst_22 {dimension_numbers = #tpu.dot_dimension_numbers<[1], [0], [0], [1], [0, 0, 1, 1], [], []>} : vector<1x32xbf16>, vector<32x128xbf16>, vector<1x128xf32> -> vector<1x128xf32>
    %101 = vector.extract_strided_slice %5 {offsets = [4, 0], sizes = [1, 128], strides = [1, 1]} : vector<8x128xf32> to vector<1x128xf32>
    %102 = arith.addf %100, %101 : vector<1x128xf32>
    %103 = math.tanh %102 : vector<1x128xf32>
    %104 = arith.negf %102 : vector<1x128xf32>
    %105 = math.exp %104 : vector<1x128xf32>
    %cst_23 = arith.constant 1.000000e+00 : f32
    %106 = vector.broadcast %cst_23 : f32 to vector<1x128xf32>
    %107 = arith.addf %106, %105 : vector<1x128xf32>
    %108 = arith.divf %106, %107 : vector<1x128xf32>
    %109 = arith.select %12, %103, %108 : vector<1x128xi1>, vector<1x128xf32>
    %110 = vector.extract_strided_slice %109 {offsets = [0, 0], sizes = [1, 32], strides = [1, 1]} : vector<1x128xf32> to vector<1x32xf32>
    %111 = vector.extract_strided_slice %109 {offsets = [0, 32], sizes = [1, 32], strides = [1, 1]} : vector<1x128xf32> to vector<1x32xf32>
    %112 = vector.extract_strided_slice %109 {offsets = [0, 64], sizes = [1, 32], strides = [1, 1]} : vector<1x128xf32> to vector<1x32xf32>
    %113 = vector.extract_strided_slice %109 {offsets = [0, 96], sizes = [1, 32], strides = [1, 1]} : vector<1x128xf32> to vector<1x32xf32>
    %114 = arith.mulf %111, %95 : vector<1x32xf32>
    %115 = arith.mulf %110, %112 : vector<1x32xf32>
    %116 = arith.addf %114, %115 : vector<1x32xf32>
    %117 = math.tanh %116 : vector<1x32xf32>
    %118 = arith.mulf %113, %117 : vector<1x32xf32>
    %c4 = arith.constant 4 : index
    %c0_24 = arith.constant 0 : index
    %119 = vector.load %arg7[%c4, %c0_24] : memref<8x32xf32, #tpu.memory_space<vmem>>, vector<1x32xf32>
    tpu.vector_store %arg7[%c4, %c0_24], %118 {strides = array<i32>} : memref<8x32xf32, #tpu.memory_space<vmem>>, vector<1x32xf32>,
    %120 = arith.truncf %118 : vector<1x32xf32> to vector<1x32xbf16>
    %cst_25 = arith.constant dense<0.000000e+00> : vector<1x128xf32>
    %121 = tpu.matmul %120, %6, %cst_25 {dimension_numbers = #tpu.dot_dimension_numbers<[1], [0], [0], [1], [0, 0, 1, 1], [], []>} : vector<1x32xbf16>, vector<32x128xbf16>, vector<1x128xf32> -> vector<1x128xf32>
    %122 = vector.extract_strided_slice %5 {offsets = [5, 0], sizes = [1, 128], strides = [1, 1]} : vector<8x128xf32> to vector<1x128xf32>
    %123 = arith.addf %121, %122 : vector<1x128xf32>
    %124 = math.tanh %123 : vector<1x128xf32>
    %125 = arith.negf %123 : vector<1x128xf32>
    %126 = math.exp %125 : vector<1x128xf32>
    %cst_26 = arith.constant 1.000000e+00 : f32
    %127 = vector.broadcast %cst_26 : f32 to vector<1x128xf32>
    %128 = arith.addf %127, %126 : vector<1x128xf32>
    %129 = arith.divf %127, %128 : vector<1x128xf32>
    %130 = arith.select %12, %124, %129 : vector<1x128xi1>, vector<1x128xf32>
    %131 = vector.extract_strided_slice %130 {offsets = [0, 0], sizes = [1, 32], strides = [1, 1]} : vector<1x128xf32> to vector<1x32xf32>
    %132 = vector.extract_strided_slice %130 {offsets = [0, 32], sizes = [1, 32], strides = [1, 1]} : vector<1x128xf32> to vector<1x32xf32>
    %133 = vector.extract_strided_slice %130 {offsets = [0, 64], sizes = [1, 32], strides = [1, 1]} : vector<1x128xf32> to vector<1x32xf32>
    %134 = vector.extract_strided_slice %130 {offsets = [0, 96], sizes = [1, 32], strides = [1, 1]} : vector<1x128xf32> to vector<1x32xf32>
    %135 = arith.mulf %132, %116 : vector<1x32xf32>
    %136 = arith.mulf %131, %133 : vector<1x32xf32>
    %137 = arith.addf %135, %136 : vector<1x32xf32>
    %138 = math.tanh %137 : vector<1x32xf32>
    %139 = arith.mulf %134, %138 : vector<1x32xf32>
    %c5 = arith.constant 5 : index
    %c0_27 = arith.constant 0 : index
    %140 = vector.load %arg7[%c5, %c0_27] : memref<8x32xf32, #tpu.memory_space<vmem>>, vector<1x32xf32>
    tpu.vector_store %arg7[%c5, %c0_27], %139 {strides = array<i32>} : memref<8x32xf32, #tpu.memory_space<vmem>>, vector<1x32xf32>,
    %141 = arith.truncf %139 : vector<1x32xf32> to vector<1x32xbf16>
    %cst_28 = arith.constant dense<0.000000e+00> : vector<1x128xf32>
    %142 = tpu.matmul %141, %6, %cst_28 {dimension_numbers = #tpu.dot_dimension_numbers<[1], [0], [0], [1], [0, 0, 1, 1], [], []>} : vector<1x32xbf16>, vector<32x128xbf16>, vector<1x128xf32> -> vector<1x128xf32>
    %143 = vector.extract_strided_slice %5 {offsets = [6, 0], sizes = [1, 128], strides = [1, 1]} : vector<8x128xf32> to vector<1x128xf32>
    %144 = arith.addf %142, %143 : vector<1x128xf32>
    %145 = math.tanh %144 : vector<1x128xf32>
    %146 = arith.negf %144 : vector<1x128xf32>
    %147 = math.exp %146 : vector<1x128xf32>
    %cst_29 = arith.constant 1.000000e+00 : f32
    %148 = vector.broadcast %cst_29 : f32 to vector<1x128xf32>
    %149 = arith.addf %148, %147 : vector<1x128xf32>
    %150 = arith.divf %148, %149 : vector<1x128xf32>
    %151 = arith.select %12, %145, %150 : vector<1x128xi1>, vector<1x128xf32>
    %152 = vector.extract_strided_slice %151 {offsets = [0, 0], sizes = [1, 32], strides = [1, 1]} : vector<1x128xf32> to vector<1x32xf32>
    %153 = vector.extract_strided_slice %151 {offsets = [0, 32], sizes = [1, 32], strides = [1, 1]} : vector<1x128xf32> to vector<1x32xf32>
    %154 = vector.extract_strided_slice %151 {offsets = [0, 64], sizes = [1, 32], strides = [1, 1]} : vector<1x128xf32> to vector<1x32xf32>
    %155 = vector.extract_strided_slice %151 {offsets = [0, 96], sizes = [1, 32], strides = [1, 1]} : vector<1x128xf32> to vector<1x32xf32>
    %156 = arith.mulf %153, %137 : vector<1x32xf32>
    %157 = arith.mulf %152, %154 : vector<1x32xf32>
    %158 = arith.addf %156, %157 : vector<1x32xf32>
    %159 = math.tanh %158 : vector<1x32xf32>
    %160 = arith.mulf %155, %159 : vector<1x32xf32>
    %c6 = arith.constant 6 : index
    %c0_30 = arith.constant 0 : index
    %161 = vector.load %arg7[%c6, %c0_30] : memref<8x32xf32, #tpu.memory_space<vmem>>, vector<1x32xf32>
    tpu.vector_store %arg7[%c6, %c0_30], %160 {strides = array<i32>} : memref<8x32xf32, #tpu.memory_space<vmem>>, vector<1x32xf32>,
    %162 = arith.truncf %160 : vector<1x32xf32> to vector<1x32xbf16>
    %cst_31 = arith.constant dense<0.000000e+00> : vector<1x128xf32>
    %163 = tpu.matmul %162, %6, %cst_31 {dimension_numbers = #tpu.dot_dimension_numbers<[1], [0], [0], [1], [0, 0, 1, 1], [], []>} : vector<1x32xbf16>, vector<32x128xbf16>, vector<1x128xf32> -> vector<1x128xf32>
    %164 = vector.extract_strided_slice %5 {offsets = [7, 0], sizes = [1, 128], strides = [1, 1]} : vector<8x128xf32> to vector<1x128xf32>
    %165 = arith.addf %163, %164 : vector<1x128xf32>
    %166 = math.tanh %165 : vector<1x128xf32>
    %167 = arith.negf %165 : vector<1x128xf32>
    %168 = math.exp %167 : vector<1x128xf32>
    %cst_32 = arith.constant 1.000000e+00 : f32
    %169 = vector.broadcast %cst_32 : f32 to vector<1x128xf32>
    %170 = arith.addf %169, %168 : vector<1x128xf32>
    %171 = arith.divf %169, %170 : vector<1x128xf32>
    %172 = arith.select %12, %166, %171 : vector<1x128xi1>, vector<1x128xf32>
    %173 = vector.extract_strided_slice %172 {offsets = [0, 0], sizes = [1, 32], strides = [1, 1]} : vector<1x128xf32> to vector<1x32xf32>
    %174 = vector.extract_strided_slice %172 {offsets = [0, 32], sizes = [1, 32], strides = [1, 1]} : vector<1x128xf32> to vector<1x32xf32>
    %175 = vector.extract_strided_slice %172 {offsets = [0, 64], sizes = [1, 32], strides = [1, 1]} : vector<1x128xf32> to vector<1x32xf32>
    %176 = vector.extract_strided_slice %172 {offsets = [0, 96], sizes = [1, 32], strides = [1, 1]} : vector<1x128xf32> to vector<1x32xf32>
    %177 = arith.mulf %174, %158 : vector<1x32xf32>
    %178 = arith.mulf %173, %175 : vector<1x32xf32>
    %179 = arith.addf %177, %178 : vector<1x32xf32>
    %180 = math.tanh %179 : vector<1x32xf32>
    %181 = arith.mulf %176, %180 : vector<1x32xf32>
    %c7 = arith.constant 7 : index
    %c0_33 = arith.constant 0 : index
    %182 = vector.load %arg7[%c7, %c0_33] : memref<8x32xf32, #tpu.memory_space<vmem>>, vector<1x32xf32>
    tpu.vector_store %arg7[%c7, %c0_33], %181 {strides = array<i32>} : memref<8x32xf32, #tpu.memory_space<vmem>>, vector<1x32xf32>,
    %c0_34 = arith.constant 0 : index
    %c0_35 = arith.constant 0 : index
    %183 = vector.load %arg7[%c0_34, %c0_35] : memref<8x32xf32, #tpu.memory_space<vmem>>, vector<8x32xf32>
    %c0_36 = arith.constant 0 : index
    %c0_37 = arith.constant 0 : index
    %184 = vector.load %arg4[%c0_36, %c0_37] : memref<32x8xf32, #tpu.memory_space<vmem>>, vector<32x8xf32>
    %cst_38 = arith.constant dense<0.000000e+00> : vector<8x8xf32>
    %185 = tpu.matmul %183, %184, %cst_38 {dimension_numbers = #tpu.dot_dimension_numbers<[1], [0], [0], [1], [0, 0, 1, 1], [], []>} : vector<8x32xf32>, vector<32x8xf32>, vector<8x8xf32> -> vector<8x8xf32>
    %c0_39 = arith.constant 0 : index
    %c0_40 = arith.constant 0 : index
    %186 = vector.load %arg5[%c0_39, %c0_40] : memref<1x8xf32, #tpu.memory_space<vmem>>, vector<1x8xf32>
    %187 = vector.broadcast %186 : vector<1x8xf32> to vector<8x8xf32>
    %188 = arith.addf %185, %187 : vector<8x8xf32>
    %cst_41 = arith.constant dense<0xFF800000> : vector<8xf32>
    %189 = vector.multi_reduction <maximumf>, %188, %cst_41 [1] : vector<8x8xf32> to vector<8xf32>
    %190 = vector.shape_cast %189 : vector<8xf32> to vector<8x1xf32>
    %191 = vector.broadcast %190 : vector<8x1xf32> to vector<8x8xf32>
    %192 = arith.subf %188, %191 : vector<8x8xf32>
    %193 = math.exp %192 : vector<8x8xf32>
    %cst_42 = arith.constant dense<0.000000e+00> : vector<8xf32>
    %194 = vector.multi_reduction <add>, %193, %cst_42 [1] : vector<8x8xf32> to vector<8xf32>
    %195 = vector.shape_cast %194 : vector<8xf32> to vector<8x1xf32>
    %196 = math.log %195 : vector<8x1xf32>
    %197 = arith.addf %196, %190 : vector<8x1xf32>
    %198 = vector.broadcast %197 : vector<8x1xf32> to vector<8x8xf32>
    %199 = arith.subf %188, %198 : vector<8x8xf32>
    %200 = tpu.transpose %199, [1, 0] : vector<8x8xf32> -> vector<8x8xf32>
    %c0_43 = arith.constant 0 : index
    %c0_44 = arith.constant 0 : index
    %201 = vector.load %arg6[%c0_43, %c0_44] : memref<8x8xf32, #tpu.memory_space<vmem>>, vector<8x8xf32>
    tpu.vector_store %arg6[%c0_43, %c0_44], %200 {strides = array<i32>} : memref<8x8xf32, #tpu.memory_space<vmem>>, vector<8x8xf32>,
    return
  }
}

</mosaic_0001>

<bundles_post_ra>
// kernel: tpu_custom_call.1
= control target key start
LH: loop header
LB: loop body
LE: loop exit
PB: predicated region body
PF: predicated region fallthrough
CT: control target
= control target key end

     0   :  { %vm38_vm0 = vcmask 130048   ;;  %s1011_s0 = inlined_call_operand.vmem [shape: bf16[8,16], index: 0, kind: input, shape index: {}]   ;;  %s1012_s1 = inlined_call_operand.vmem [shape: bf16[16,128], index: 1, kind: input, shape index: {}]   ;;  %s1013_s2 = inlined_call_operand.vmem [shape: bf16[32,128], index: 2, kind: input, shape index: {}]   ;;  %s1014_s3 = inlined_call_operand.vmem [shape: f32[1,128], index: 3, kind: input, shape index: {}]   ;;  %s1015_s4 = inlined_call_operand.vmem [shape: f32[32,8], index: 4, kind: input, shape index: {}]   ;;  %s1016_s5 = inlined_call_operand.vmem [shape: f32[1,8], index: 5, kind: input, shape index: {}]   ;;  %s1017_s6 = inlined_call_operand.hbm [shape: f32[8,8], index: 6, kind: output, shape index: {}]  }
   0x1   :  { %v717_v0 = vld [vmem:[%s1012_s1] sm:$0xff]  ;;  %v719_v1 = vld [vmem:[%s1013_s2 + $0x8] sm:$0xff] }
   0x2   :  { %v25_v2 = vld [vmem:[%s1011_s0] sm:$0xf]  ;;  %49 = vmatpush.bf16.msra.mxu0 %v717_v0  ;;  %86 = vmatpush.bf16.msra.mxu1 %v719_v1 }
   0x3   :  { %v718_v3 = vld [vmem:[%s1013_s2] sm:$0xff] }
   0x4   :  { %11 = vsyncpa [#allocation4], 0  ;;  %153 = vmatpush.bf16.msra.mxu2 %v719_v1  ;;  %218 = vmatpush.bf16.msra.mxu3 %v719_v1  ;;  %v821_v4 = vmov 0   ;;  %v725_v5 = vld [vmem:[%s1014_s3] ss:$0 sm:$0xff]  ;;  %v59_v15 = vlaneseq  ;;  %s822_s2 = smov 64  }
   0x5   :  { %692 = vmatmul.msk.bf16.vlgmr.msra.gmra.mxu0 %vm38_vm0, %v25_v2  ;;  %s823_s3 = smov 32   ;;  %vm76_vm8 = vcmask 261120   ;;  %s679_s17 = sshll.u32 %s1017_s6, 4  ;;  %s680_s17 = int_to_ptr.hbm [resolvable:$true] %s679_s17 }
   0x6   :  { %283 = vmatpush.bf16.msrb.mxu0 %v719_v1  ;;  %87 = vmatpush.bf16.msra.mxu1 %v718_v3  ;;  %v60_v17 = vand.u32 127, %v59_v15 }
   0x8   :  { %154 = vmatpush.bf16.msra.mxu2 %v718_v3  ;;  %219 = vmatpush.bf16.msra.mxu3 %v718_v3  ;;  %vm61_vm1 = vcmp.ge.s32.totalorder %v60_v17, 64  ;;  %vm62_vm2 = vcmp.lt.s32.totalorder %v60_v17, 96 }
   0x9   :  { %88 = vmatmul.bf16.vlgmr.msra.gmra.mxu1 %v821_v4  ;;  %vm878_vm4 = vmand %vm61_vm1, %vm62_vm2 }
   0xa   :  { %284 = vmatpush.bf16.msrb.mxu0 %v718_v3  ;;  %348 = vmatpush.bf16.msrb.mxu1 %v719_v1 }
   0xc   :  { %413 = vmatpush.bf16.msrb.mxu2 %v719_v1  ;;  %478 = vmatpush.bf16.msrb.mxu3 %v719_v1 }
   0xe   :  { %543 = vmatpush.bf16.msra.mxu0 %v719_v1  ;;  %349 = vmatpush.bf16.msrb.mxu1 %v718_v3 }
  0x10   :  { %414 = vmatpush.bf16.msrb.mxu2 %v718_v3  ;;  %479 = vmatpush.bf16.msrb.mxu3 %v718_v3 }
  0x12   :  { %544 = vmatpush.bf16.msra.mxu0 %v718_v3 }
  0x82   :  { %v51_v6 = vpop.f32.mrf.mxu0 }
  0x83   :  { %v875_v7 = vadd.f32 %v725_v5, %v51_v6 }
  0x85   :  { %v142_v40 = vrot.slane %v875_v7, 1  ;;  %v207_v5 = vrot.slane %v875_v7, 2 }
  0x86   :  { %v89_v8 = vpop.f32.mrf.mxu1 }
  0x87   :  { %v90_v9 = vadd.f32 %v89_v8, %v875_v7 }
  0x89   :  { %v701_v10 = vmul.f32 -1.442695, %v90_v9 }
  0x8a   :  { %v53_v11 = vpop.f32.mrf.mxu0 }
  0x8b   :  { %727 = vpow2.f32 %v701_v10 }
  0x8e   :  { %v91_v12 = vpop.f32.mrf.mxu1 }
  0x91   :  { %v728_v13 = vpop.eup %727 }
  0x92   :  { %v97_v14 = vadd.f32 1.0, %v728_v13 }
  0x94   :  { %729 = vrcp.f32 %v97_v14  ;;  %v109_v20 = vand.u32 2147483648, %v97_v14  ;;  %v107_v22 = vand.u32 2147483647, %v97_v14  ;;  %vm103_vm5 = vweird.f32 %v97_v14 }
  0x95   :  { %731 = vtanh.f32 %v90_v9 }
  0x96   :  { %v110_v25 = vor.u32 1.1754944e-38, %v109_v20  ;;  %vm108_vm7 = vcmp.eq.f32.partialorder %v107_v22, 8.507059e+37 }
  0x9a   :  { %v730_v16 = vpop.eup %729 }
  0x9b   :  { %v99_v18 = vmul.f32 %v730_v16, %v97_v14  ;;  %vm104_vm3 = vweird.f32 %v730_v16  ;;  %v732_v27 = vpop.eup %731 }
  0x9c   :  { %vm105_vm6 = vmor %vm103_vm5, %vm104_vm3 }
  0x9d   :  { %v100_v19 = vsub.f32 1.0, %v99_v18 }
  0x9f   :  { %v101_v21 = vmul.f32 %v730_v16, %v100_v19 }
  0xa1   :  { %v102_v24 = vadd.f32 %v730_v16, %v101_v21 }
  0xa3   :  { %v106_v26 = vsel %vm105_vm6, %v730_v16, %v102_v24 }
  0xa4   :  { %v111_v28 = vsel %vm108_vm7, %v110_v25, %v106_v26 }
  0xa5   :  { %v113_v29 = vsel %vm878_vm4, %v732_v27, %v111_v28 }
  0xa6   :  { %116 = vrot.lane.b32.xlu0 %v113_v29, %s822_s2  ;;  %v114_v32 = vmul.f32 0.0, %v113_v29 }
 0x118   :  { %v117_v30 = vpop.permute.xlu0 %116 }
 0x119   :  { %v119_v31 = vmul.f32 %v117_v30, %v113_v29 }
 0x11b   :  { %121 = vrot.lane.b32.xlu0 %v119_v31, %s823_s3 }
 0x18d   :  { %v122_v33 = vpop.permute.xlu0 %121 }
 0x18e   :  { %v124_v34 = vadd.f32 %v122_v33, %v114_v32 }
 0x190   :  { %733 = vtanh.f32 %v124_v34 }
 0x196   :  { %v734_v35 = vpop.eup %733 }
 0x197   :  { %127 = vrot.lane.b32.xlu1 %v734_v35, %s822_s2 }
 0x209   :  { %v128_v36 = vpop.permute.xlu1 %127 }
 0x20a   :  { %v887_v37 = vmul.f32 %v128_v36, %v113_v29  ;;  %v272_v36 = vrot.slane %v875_v7, 3 }
 0x20c   :  { %v137_v38 = vpack.c.bf16 %v887_v37, %v887_v37 }
 0x20e   :  { %139 = vrot.lane.b32.xlu1 %v137_v38, %s823_s3 }
 0x280   :  { %v140_v39 = vpop.permute.xlu1 %139 }
 0x281   :  { %702 = vmatmul.msk.bf16.vlgmr.msra.gmra.mxu2 %vm76_vm8, %v140_v39 }
 0x304   :  { %v156_v41 = vpop.f32.mrf.mxu2 }
 0x305   :  { %v157_v42 = vadd.f32 %v156_v41, %v142_v40 }
 0x307   :  { %v703_v43 = vmul.f32 -1.442695, %v157_v42 }
 0x309   :  { %735 = vpow2.f32 %v703_v43 }
 0x30c   :  { %v158_v44 = vpop.f32.mrf.mxu2 }
 0x30f   :  { %v736_v45 = vpop.eup %735 }
 0x310   :  { %v164_v46 = vadd.f32 1.0, %v736_v45 }
 0x312   :  { %737 = vrcp.f32 %v164_v46  ;;  %v176_v50 = vand.u32 2147483648, %v164_v46  ;;  %v174_v52 = vand.u32 2147483647, %v164_v46  ;;  %vm170_vm10 = vweird.f32 %v164_v46 }
 0x313   :  { %739 = vtanh.f32 %v157_v42 }
 0x314   :  { %v177_v54 = vor.u32 1.1754944e-38, %v176_v50  ;;  %vm175_vm12 = vcmp.eq.f32.partialorder %v174_v52, 8.507059e+37 }
 0x318   :  { %v738_v47 = vpop.eup %737 }
 0x319   :  { %v166_v48 = vmul.f32 %v738_v47, %v164_v46  ;;  %vm171_vm9 = vweird.f32 %v738_v47  ;;  %v740_v56 = vpop.eup %739 }
 0x31a   :  { %vm172_vm11 = vmor %vm170_vm10, %vm171_vm9 }
 0x31b   :  { %v167_v49 = vsub.f32 1.0, %v166_v48 }
 0x31d   :  { %v168_v51 = vmul.f32 %v738_v47, %v167_v49 }
 0x31f   :  { %v169_v53 = vadd.f32 %v738_v47, %v168_v51 }
 0x321   :  { %v173_v55 = vsel %vm172_vm11, %v738_v47, %v169_v53 }
 0x322   :  { %v178_v57 = vsel %vm175_vm12, %v177_v54, %v173_v55 }
 0x323   :  { %v180_v58 = vsel %vm878_vm4, %v740_v56, %v178_v57 }
 0x324   :  { %183 = vrot.lane.b32.xlu2 %v180_v58, %s822_s2  ;;  %v181_v61 = vmul.f32 %v180_v58, %v124_v34 }
 0x37e   :  { %v184_v59 = vpop.permute.xlu2 %183 }
 0x37f   :  { %v186_v60 = vmul.f32 %v184_v59, %v180_v58 }
 0x381   :  { %188 = vrot.lane.b32.xlu2 %v186_v60, %s823_s3 }
 0x3db   :  { %v189_v62 = vpop.permute.xlu2 %188 }
 0x3dc   :  { %v191_v63 = vadd.f32 %v189_v62, %v181_v61 }
 0x3de   :  { %741 = vtanh.f32 %v191_v63 }
 0x3e4   :  { %v742_v0 = vpop.eup %741 }
 0x3e5   :  { %194 = vrot.lane.b32.xlu0 %v742_v0, %s822_s2 }
 0x457   :  { %v195_v1 = vpop.permute.xlu0 %194 }
 0x458   :  { %v899_v2 = vmul.f32 %v195_v1, %v180_v58 }
 0x45a   :  { %v203_v3 = vpack.c.bf16 %v899_v2, %v899_v2 }
 0x45c   :  { %205 = vrot.lane.b32.xlu1 %v203_v3, %s823_s3  ;;  %v337_v3 = vrot.slane %v875_v7, 4 }
 0x4ce   :  { %v206_v4 = vpop.permute.xlu1 %205 }
 0x4cf   :  { %704 = vmatmul.msk.bf16.vlgmr.msra.gmra.mxu3 %vm76_vm8, %v206_v4 }
 0x552   :  { %v221_v6 = vpop.f32.mrf.mxu3 }
 0x553   :  { %v222_v8 = vadd.f32 %v221_v6, %v207_v5 }
 0x555   :  { %v705_v9 = vmul.f32 -1.442695, %v222_v8 }
 0x557   :  { %743 = vpow2.f32 %v705_v9 }
 0x55a   :  { %v223_v10 = vpop.f32.mrf.mxu3 }
 0x55d   :  { %v744_v11 = vpop.eup %743 }
 0x55e   :  { %v229_v12 = vadd.f32 1.0, %v744_v11 }
 0x560   :  { %745 = vrcp.f32 %v229_v12  ;;  %v241_v16 = vand.u32 2147483648, %v229_v12  ;;  %v239_v18 = vand.u32 2147483647, %v229_v12  ;;  %vm235_vm14 = vweird.f32 %v229_v12 }
 0x561   :  { %747 = vtanh.f32 %v222_v8 }
 0x562   :  { %v242_v20 = vor.u32 1.1754944e-38, %v241_v16  ;;  %vm240_vm0 = vcmp.eq.f32.partialorder %v239_v18, 8.507059e+37 }
 0x566   :  { %v746_v13 = vpop.eup %745 }
 0x567   :  { %v231_v14 = vmul.f32 %v746_v13, %v229_v12  ;;  %vm236_vm13 = vweird.f32 %v746_v13  ;;  %v748_v22 = vpop.eup %747 }
 0x568   :  { %vm237_vm15 = vmor %vm235_vm14, %vm236_vm13 }
 0x569   :  { %v232_v15 = vsub.f32 1.0, %v231_v14 }
 0x56b   :  { %v233_v17 = vmul.f32 %v746_v13, %v232_v15 }
 0x56d   :  { %v234_v19 = vadd.f32 %v746_v13, %v233_v17 }
 0x56f   :  { %v238_v21 = vsel %vm237_vm15, %v746_v13, %v234_v19 }
 0x570   :  { %v243_v24 = vsel %vm240_vm0, %v242_v20, %v238_v21 }
 0x571   :  { %v245_v25 = vsel %vm878_vm4, %v748_v22, %v243_v24 }
 0x572   :  { %248 = vrot.lane.b32.xlu2 %v245_v25, %s822_s2  ;;  %v246_v28 = vmul.f32 %v245_v25, %v191_v63 }
 0x5cc   :  { %v249_v26 = vpop.permute.xlu2 %248 }
 0x5cd   :  { %v251_v27 = vmul.f32 %v249_v26, %v245_v25 }
 0x5cf   :  { %253 = vrot.lane.b32.xlu0 %v251_v27, %s823_s3 }
 0x641   :  { %v254_v29 = vpop.permute.xlu0 %253 }
 0x642   :  { %v256_v30 = vadd.f32 %v254_v29, %v246_v28 }
 0x644   :  { %749 = vtanh.f32 %v256_v30 }
 0x64a   :  { %v750_v31 = vpop.eup %749 }
 0x64b   :  { %259 = vrot.lane.b32.xlu1 %v750_v31, %s822_s2 }
 0x6bd   :  { %v260_v32 = vpop.permute.xlu1 %259 }
 0x6be   :  { %v911_v33 = vmul.f32 %v260_v32, %v245_v25 }
 0x6c0   :  { %v268_v34 = vpack.c.bf16 %v911_v33, %v911_v33 }
 0x6c2   :  { %270 = vrot.lane.b32.xlu2 %v268_v34, %s823_s3 }
 0x71c   :  { %v271_v35 = vpop.permute.xlu2 %270 }
 0x71d   :  { %706 = vmatmul.msk.bf16.vlgmr.msrb.gmra.mxu0 %vm76_vm8, %v271_v35  ;;  %v402_v35 = vrot.slane %v875_v7, 5 }
 0x79a   :  { %v286_v38 = vpop.f32.mrf.mxu0 }
 0x79b   :  { %v287_v39 = vadd.f32 %v286_v38, %v272_v36 }
 0x79d   :  { %v707_v40 = vmul.f32 -1.442695, %v287_v39 }
 0x79f   :  { %751 = vpow2.f32 %v707_v40 }
 0x7a2   :  { %v288_v41 = vpop.f32.mrf.mxu0 }
 0x7a5   :  { %v752_v42 = vpop.eup %751 }
 0x7a6   :  { %v294_v43 = vadd.f32 1.0, %v752_v42 }
 0x7a8   :  { %753 = vrcp.f32 %v294_v43  ;;  %v306_v47 = vand.u32 2147483648, %v294_v43  ;;  %v304_v49 = vand.u32 2147483647, %v294_v43  ;;  %vm300_vm2 = vweird.f32 %v294_v43 }
 0x7a9   :  { %755 = vtanh.f32 %v287_v39 }
 0x7aa   :  { %v307_v51 = vor.u32 1.1754944e-38, %v306_v47  ;;  %vm305_vm5 = vcmp.eq.f32.partialorder %v304_v49, 8.507059e+37 }
 0x7ae   :  { %v754_v44 = vpop.eup %753 }
 0x7af   :  { %v296_v45 = vmul.f32 %v754_v44, %v294_v43  ;;  %vm301_vm1 = vweird.f32 %v754_v44  ;;  %v756_v53 = vpop.eup %755 }
 0x7b0   :  { %vm302_vm3 = vmor %vm300_vm2, %vm301_vm1 }
 0x7b1   :  { %v297_v46 = vsub.f32 1.0, %v296_v45 }
 0x7b3   :  { %v298_v48 = vmul.f32 %v754_v44, %v297_v46 }
 0x7b5   :  { %v299_v50 = vadd.f32 %v754_v44, %v298_v48 }
 0x7b7   :  { %v303_v52 = vsel %vm302_vm3, %v754_v44, %v299_v50 }
 0x7b8   :  { %v308_v54 = vsel %vm305_vm5, %v307_v51, %v303_v52 }
 0x7b9   :  { %v310_v55 = vsel %vm878_vm4, %v756_v53, %v308_v54 }
 0x7ba   :  { %313 = vrot.lane.b32.xlu0 %v310_v55, %s822_s2  ;;  %v311_v58 = vmul.f32 %v310_v55, %v256_v30 }
 0x82c   :  { %v314_v56 = vpop.permute.xlu0 %313 }
 0x82d   :  { %v316_v57 = vmul.f32 %v314_v56, %v310_v55 }
 0x82f   :  { %318 = vrot.lane.b32.xlu1 %v316_v57, %s823_s3 }
 0x8a1   :  { %v319_v59 = vpop.permute.xlu1 %318 }
 0x8a2   :  { %v321_v60 = vadd.f32 %v319_v59, %v311_v58 }
 0x8a4   :  { %757 = vtanh.f32 %v321_v60 }
 0x8aa   :  { %v758_v61 = vpop.eup %757 }
 0x8ab   :  { %324 = vrot.lane.b32.xlu2 %v758_v61, %s822_s2 }
 0x905   :  { %v325_v62 = vpop.permute.xlu2 %324 }
 0x906   :  { %v923_v63 = vmul.f32 %v325_v62, %v310_v55 }
 0x908   :  { %v333_v0 = vpack.c.bf16 %v923_v63, %v923_v63 }
 0x90a   :  { %335 = vrot.lane.b32.xlu0 %v333_v0, %s823_s3 }
 0x97c   :  { %v336_v1 = vpop.permute.xlu0 %335 }
 0x97d   :  { %708 = vmatmul.msk.bf16.vlgmr.msrb.gmra.mxu1 %vm76_vm8, %v336_v1 }
 0x9fa   :  { %v351_v4 = vpop.f32.mrf.mxu1 }
 0x9fb   :  { %v352_v5 = vadd.f32 %v351_v4, %v337_v3  ;;  %v467_v3 = vrot.slane %v875_v7, 6 }
 0x9fd   :  { %v709_v6 = vmul.f32 -1.442695, %v352_v5 }
 0x9ff   :  { %759 = vpow2.f32 %v709_v6 }
 0xa02   :  { %v353_v8 = vpop.f32.mrf.mxu1 }
 0xa05   :  { %v760_v9 = vpop.eup %759 }
 0xa06   :  { %v359_v10 = vadd.f32 1.0, %v760_v9 }
 0xa08   :  { %761 = vrcp.f32 %v359_v10  ;;  %v371_v14 = vand.u32 2147483648, %v359_v10  ;;  %v369_v16 = vand.u32 2147483647, %v359_v10  ;;  %vm365_vm7 = vweird.f32 %v359_v10 }
 0xa09   :  { %763 = vtanh.f32 %v352_v5 }
 0xa0a   :  { %v372_v18 = vor.u32 1.1754944e-38, %v371_v14  ;;  %vm370_vm10 = vcmp.eq.f32.partialorder %v369_v16, 8.507059e+37 }
 0xa0e   :  { %v762_v11 = vpop.eup %761 }
 0xa0f   :  { %v361_v12 = vmul.f32 %v762_v11, %v359_v10  ;;  %vm366_vm6 = vweird.f32 %v762_v11  ;;  %v764_v20 = vpop.eup %763 }
 0xa10   :  { %vm367_vm9 = vmor %vm365_vm7, %vm366_vm6 }
 0xa11   :  { %v362_v13 = vsub.f32 1.0, %v361_v12 }
 0xa13   :  { %v363_v15 = vmul.f32 %v762_v11, %v362_v13 }
 0xa15   :  { %v364_v17 = vadd.f32 %v762_v11, %v363_v15 }
 0xa17   :  { %v368_v19 = vsel %vm367_vm9, %v762_v11, %v364_v17  ;;  %vm135_vm9 = vcmask 253952  }
 0xa18   :  { %v373_v21 = vsel %vm370_vm10, %v372_v18, %v368_v19 }
 0xa19   :  { %v375_v22 = vsel %vm878_vm4, %v764_v20, %v373_v21 }
 0xa1a   :  { %378 = vrot.lane.b32.xlu1 %v375_v22, %s822_s2  ;;  %v376_v26 = vmul.f32 %v375_v22, %v321_v60 }
 0xa8c   :  { %v379_v24 = vpop.permute.xlu1 %378 }
 0xa8d   :  { %v381_v25 = vmul.f32 %v379_v24, %v375_v22 }
 0xa8f   :  { %383 = vrot.lane.b32.xlu2 %v381_v25, %s823_s3 }
 0xae9   :  { %v384_v27 = vpop.permute.xlu2 %383 }
 0xaea   :  { %v386_v28 = vadd.f32 %v384_v27, %v376_v26 }
 0xaec   :  { %765 = vtanh.f32 %v386_v28 }
 0xaf2   :  { %v766_v29 = vpop.eup %765 }
 0xaf3   :  { %389 = vrot.lane.b32.xlu0 %v766_v29, %s822_s2 }
 0xb65   :  { %v390_v30 = vpop.permute.xlu0 %389 }
 0xb66   :  { %v935_v31 = vmul.f32 %v390_v30, %v375_v22 }
 0xb68   :  { %v398_v32 = vpack.c.bf16 %v935_v31, %v935_v31 }
 0xb6a   :  { %400 = vrot.lane.b32.xlu1 %v398_v32, %s823_s3 }
 0xbdc   :  { %v401_v34 = vpop.permute.xlu1 %400 }
 0xbdd   :  { %710 = vmatmul.msk.bf16.vlgmr.msrb.gmra.mxu2 %vm76_vm8, %v401_v34 }
 0xc60   :  { %v416_v36 = vpop.f32.mrf.mxu2 }
 0xc61   :  { %v417_v38 = vadd.f32 %v416_v36, %v402_v35  ;;  %v532_v36 = vrot.slane %v875_v7, 7 }
 0xc63   :  { %v711_v39 = vmul.f32 -1.442695, %v417_v38 }
 0xc65   :  { %767 = vpow2.f32 %v711_v39 }
 0xc68   :  { %v418_v40 = vpop.f32.mrf.mxu2 }
 0xc6b   :  { %v768_v41 = vpop.eup %767 }
 0xc6c   :  { %v424_v42 = vadd.f32 1.0, %v768_v41 }
 0xc6e   :  { %769 = vrcp.f32 %v424_v42  ;;  %v436_v46 = vand.u32 2147483648, %v424_v42  ;;  %v434_v48 = vand.u32 2147483647, %v424_v42  ;;  %vm430_vm12 = vweird.f32 %v424_v42 }
 0xc6f   :  { %771 = vtanh.f32 %v417_v38 }
 0xc70   :  { %v437_v50 = vor.u32 1.1754944e-38, %v436_v46  ;;  %vm435_vm14 = vcmp.eq.f32.partialorder %v434_v48, 8.507059e+37 }
 0xc74   :  { %v770_v43 = vpop.eup %769 }
 0xc75   :  { %v426_v44 = vmul.f32 %v770_v43, %v424_v42  ;;  %vm431_vm11 = vweird.f32 %v770_v43  ;;  %v772_v52 = vpop.eup %771 }
 0xc76   :  { %vm432_vm13 = vmor %vm430_vm12, %vm431_vm11 }
 0xc77   :  { %v427_v45 = vsub.f32 1.0, %v426_v44 }
 0xc79   :  { %v428_v47 = vmul.f32 %v770_v43, %v427_v45 }
 0xc7b   :  { %v429_v49 = vadd.f32 %v770_v43, %v428_v47 }
 0xc7d   :  { %v433_v51 = vsel %vm432_vm13, %v770_v43, %v429_v49 }
 0xc7e   :  { %v438_v53 = vsel %vm435_vm14, %v437_v50, %v433_v51 }
 0xc7f   :  { %v440_v54 = vsel %vm878_vm4, %v772_v52, %v438_v53 }
 0xc80   :  { %443 = vrot.lane.b32.xlu2 %v440_v54, %s822_s2  ;;  %v441_v57 = vmul.f32 %v440_v54, %v386_v28 }
 0xcda   :  { %v444_v55 = vpop.permute.xlu2 %443 }
 0xcdb   :  { %v446_v56 = vmul.f32 %v444_v55, %v440_v54 }
 0xcdd   :  { %448 = vrot.lane.b32.xlu0 %v446_v56, %s823_s3 }
 0xd4f   :  { %v449_v58 = vpop.permute.xlu0 %448 }
 0xd50   :  { %v451_v59 = vadd.f32 %v449_v58, %v441_v57 }
 0xd52   :  { %773 = vtanh.f32 %v451_v59 }
 0xd58   :  { %v774_v60 = vpop.eup %773 }
 0xd59   :  { %454 = vrot.lane.b32.xlu1 %v774_v60, %s822_s2 }
 0xdcb   :  { %v455_v61 = vpop.permute.xlu1 %454 }
 0xdcc   :  { %v947_v62 = vmul.f32 %v455_v61, %v440_v54 }
 0xdce   :  { %v463_v0 = vpack.c.bf16 %v947_v62, %v947_v62 }
 0xdd0   :  { %465 = vrot.lane.b32.xlu2 %v463_v0, %s823_s3  ;;  %v596_v0 = vld [vmem:[%s1015_s4 + $0x10] sm:$0xff] }
 0xe2a   :  { %v466_v1 = vpop.permute.xlu2 %465 }
 0xe2b   :  { %712 = vmatmul.msk.bf16.vlgmr.msrb.gmra.mxu3 %vm76_vm8, %v466_v1 }
 0xeae   :  { %v481_v4 = vpop.f32.mrf.mxu3 }
 0xeaf   :  { %v482_v5 = vadd.f32 %v481_v4, %v467_v3 }
 0xeb1   :  { %v713_v6 = vmul.f32 -1.442695, %v482_v5 }
 0xeb3   :  { %775 = vpow2.f32 %v713_v6 }
 0xeb6   :  { %v483_v8 = vpop.f32.mrf.mxu3 }
 0xeb9   :  { %v776_v9 = vpop.eup %775 }
 0xeba   :  { %v489_v10 = vadd.f32 1.0, %v776_v9  ;;  %v726_v9 = vld [vmem:[%s1016_s5] ss:$0 sm:$0xff] }
 0xebc   :  { %777 = vrcp.f32 %v489_v10  ;;  %v501_v14 = vand.u32 2147483648, %v489_v10  ;;  %v499_v16 = vand.u32 2147483647, %v489_v10  ;;  %vm495_vm0 = vweird.f32 %v489_v10 }
 0xebd   :  { %779 = vtanh.f32 %v482_v5  ;;  %v594_v5 = vld [vmem:[%s1015_s4] sm:$0xff] }
 0xebe   :  { %v502_v18 = vor.u32 1.1754944e-38, %v501_v14  ;;  %vm500_vm2 = vcmp.eq.f32.partialorder %v499_v16, 8.507059e+37 }
 0xec2   :  { %v778_v11 = vpop.eup %777 }
 0xec3   :  { %v491_v12 = vmul.f32 %v778_v11, %v489_v10  ;;  %vm496_vm15 = vweird.f32 %v778_v11  ;;  %v780_v20 = vpop.eup %779 }
 0xec4   :  { %vm497_vm1 = vmor %vm495_vm0, %vm496_vm15 }
 0xec5   :  { %v492_v13 = vsub.f32 1.0, %v491_v12 }
 0xec7   :  { %v493_v15 = vmul.f32 %v778_v11, %v492_v13 }
 0xec9   :  { %v494_v17 = vadd.f32 %v778_v11, %v493_v15 }
 0xecb   :  { %v498_v19 = vsel %vm497_vm1, %v778_v11, %v494_v17 }
 0xecc   :  { %v503_v21 = vsel %vm500_vm2, %v502_v18, %v498_v19 }
 0xecd   :  { %v505_v22 = vsel %vm878_vm4, %v780_v20, %v503_v21 }
 0xece   :  { %508 = vrot.lane.b32.xlu0 %v505_v22, %s822_s2  ;;  %v506_v26 = vmul.f32 %v505_v22, %v451_v59 }
 0xf40   :  { %v509_v24 = vpop.permute.xlu0 %508 }
 0xf41   :  { %v511_v25 = vmul.f32 %v509_v24, %v505_v22 }
 0xf43   :  { %513 = vrot.lane.b32.xlu1 %v511_v25, %s823_s3 }
 0xfb5   :  { %v514_v27 = vpop.permute.xlu1 %513 }
 0xfb6   :  { %v516_v28 = vadd.f32 %v514_v27, %v506_v26 }
 0xfb8   :  { %781 = vtanh.f32 %v516_v28 }
 0xfbe   :  { %v782_v29 = vpop.eup %781 }
 0xfbf   :  { %519 = vrot.lane.b32.xlu2 %v782_v29, %s822_s2 }
0x1019   :  { %v520_v30 = vpop.permute.xlu2 %519 }
0x101a   :  { %v522_v32 = vmul.f32 %v520_v30, %v505_v22 }
0x101c   :  { %v528_v34 = vpack.c.bf16 %v522_v32, %v522_v32 }
0x101e   :  { %530 = vrot.lane.b32.xlu0 %v528_v34, %s823_s3 }
0x1090   :  { %v531_v35 = vpop.permute.xlu0 %530 }
0x1091   :  { %714 = vmatmul.msk.bf16.vlgmr.msra.gmra.mxu0 %vm76_vm8, %v531_v35 }
0x110e   :  { %v546_v38 = vpop.f32.mrf.mxu0 }
0x110f   :  { %v547_v39 = vadd.f32 %v546_v38, %v532_v36 }
0x1111   :  { %v715_v40 = vmul.f32 -1.442695, %v547_v39 }
0x1113   :  { %783 = vpow2.f32 %v715_v40 }
0x1116   :  { %v548_v41 = vpop.f32.mrf.mxu0 }
0x1119   :  { %v784_v42 = vpop.eup %783 }
0x111a   :  { %v554_v43 = vadd.f32 1.0, %v784_v42 }
0x111c   :  { %785 = vrcp.f32 %v554_v43  ;;  %v566_v47 = vand.u32 2147483648, %v554_v43  ;;  %v564_v49 = vand.u32 2147483647, %v554_v43  ;;  %vm560_vm5 = vweird.f32 %v554_v43 }
0x111d   :  { %787 = vtanh.f32 %v547_v39 }
0x111e   :  { %v567_v7 = vor.u32 1.1754944e-38, %v566_v47  ;;  %vm565_vm7 = vcmp.eq.f32.partialorder %v564_v49, 8.507059e+37 }
0x1122   :  { %v786_v44 = vpop.eup %785 }
0x1123   :  { %v556_v45 = vmul.f32 %v786_v44, %v554_v43  ;;  %vm561_vm3 = vweird.f32 %v786_v44  ;;  %v788_v52 = vpop.eup %787 }
0x1124   :  { %vm562_vm6 = vmor %vm560_vm5, %vm561_vm3 }
0x1125   :  { %v557_v46 = vsub.f32 1.0, %v556_v45 }
0x1127   :  { %v558_v48 = vmul.f32 %v786_v44, %v557_v46 }
0x1129   :  { %v559_v50 = vadd.f32 %v786_v44, %v558_v48 }
0x112b   :  { %v563_v51 = vsel %vm562_vm6, %v786_v44, %v559_v50 }
0x112c   :  { %v568_v53 = vsel %vm565_vm7, %v567_v7, %v563_v51 }
0x112d   :  { %v570_v54 = vsel %vm878_vm4, %v788_v52, %v568_v53  ;;  %vm625_vm4 = vcmask 64512  }
0x112e   :  { %573 = vrot.lane.b32.xlu1 %v570_v54, %s822_s2 }
0x1136   :  { %132 = vrot.lane.b32.xlu1 %v887_v37, %s823_s3 }
0x113e   :  { %329 = vrot.lane.b32.xlu1 %v923_v63, %s823_s3  ;;  %v571_v63 = vmul.f32 %v570_v54, %v516_v28 }
0x1146   :  { %524 = vrot.lane.b32.xlu1 %v522_v32, %s823_s3 }
0x11a0   :  { %v574_v55 = vpop.permute.xlu1 %573 }
0x11a1   :  { %v576_v56 = vmul.f32 %v574_v55, %v570_v54 }
0x11a3   :  { %578 = vrot.lane.b32.xlu2 %v576_v56, %s823_s3 }
0x11a8   :  { %v133_v57 = vpop.permute.xlu1 %132 }
0x11a9   :  { %136 = vst.msk [vmem:[#allocation2] sm:$0x1] %vm135_vm9, %v133_v57 }
0x11ab   :  { %199 = vrot.lane.b32.xlu2 %v899_v2, %s823_s3 }
0x11b0   :  { %v330_v23 = vpop.permute.xlu1 %329 }
0x11b1   :  { %332 = vst.msk [vmem:[#allocation2 + $0x3] sm:$0x1] %vm135_vm9, %v330_v23 }
0x11b3   :  { %394 = vrot.lane.b32.xlu2 %v935_v31, %s823_s3  ;;  %v597_v31 = vld [vmem:[%s1015_s4 + $0x18] sm:$0xff] }
0x11b4   :  { %617 = vmatpush.msra.mxu1 %v597_v31 }
0x11b6   :  { %618 = vmatpush.msra.mxu1 %v596_v0 }
0x11b8   :  { %v525_v37 = vpop.permute.xlu1 %524 }
0x11b9   :  { %527 = vst.msk [vmem:[#allocation2 + $0x6] sm:$0x1] %vm135_vm9, %v525_v37 }
0x11fd   :  { %v579_v58 = vpop.permute.xlu2 %578 }
0x11fe   :  { %v581_v59 = vadd.f32 %v579_v58, %v571_v63 }
0x1200   :  { %789 = vtanh.f32 %v581_v59 }
0x1205   :  { %v200_v60 = vpop.permute.xlu2 %199 }
0x1206   :  { %v790_v61 = vpop.eup %789  ;;  %202 = vst.msk [vmem:[#allocation2 + $0x1] sm:$0x1] %vm135_vm9, %v200_v60 }
0x1207   :  { %584 = vrot.lane.b32.xlu0 %v790_v61, %s822_s2 }
0x120d   :  { %v395_v2 = vpop.permute.xlu2 %394 }
0x120e   :  { %397 = vst.msk [vmem:[#allocation2 + $0x4] sm:$0x1] %vm135_vm9, %v395_v2 }
0x120f   :  { %264 = vrot.lane.b32.xlu0 %v911_v33, %s823_s3 }
0x1217   :  { %459 = vrot.lane.b32.xlu0 %v947_v62, %s823_s3  ;;  %v595_v62 = vld [vmem:[%s1015_s4 + $0x8] sm:$0xff]  ;;  %s824_s4 = smov [#allocation3]  }
0x1218   :  { %619 = vmatpush.msra.mxu1 %v595_v62  ;;  %s677_s5 = sshll.u32 %s824_s4, 4  ;;  %s678_s5 = int_to_ptr.vmem [resolvable:$true] %s677_s5 }
0x121a   :  { %620 = vmatpush.msra.mxu1 %v594_v5 }
0x1279   :  { %v585_v1 = vpop.permute.xlu0 %584 }
0x127a   :  { %v587_v3 = vmul.f32 %v585_v1, %v570_v54 }
0x127c   :  { %589 = vrot.lane.b32.xlu2 %v587_v3, %s823_s3 }
0x1281   :  { %v265_v4 = vpop.permute.xlu0 %264 }
0x1282   :  { %267 = vst.msk [vmem:[#allocation2 + $0x2] sm:$0x1] %vm135_vm9, %v265_v4 }
0x1289   :  { %v460_v33 = vpop.permute.xlu0 %459 }
0x128a   :  { %462 = vst.msk [vmem:[#allocation2 + $0x5] sm:$0x1] %vm135_vm9, %v460_v33 }
0x12d6   :  { %v590_v6 = vpop.permute.xlu2 %589 }
0x12d7   :  { %592 = vst.msk [vmem:[#allocation2 + $0x7] sm:$0x1] %vm135_vm9, %v590_v6 }
0x12de   :  { %v593_v8 = vld [vmem:[#allocation2] sm:$0xff] }
0x12df   :  { %716 = vmatmul.msk.f32.vlgmr.msra.gmra.mxu1 %vm76_vm8, %v593_v8 }
0x135c   :  { %v622_v10 = vpop.f32.mrf.mxu1 }
0x135d   :  { %v623_v11 = vadd.f32 %v726_v9, %v622_v10 }
0x135f   :  { %v626_v12 = vsel %vm625_vm4, %v623_v11, -inf }
0x1360   :  { %627 = vmax.xlane.f32.xlu0 %v626_v12 }
0x13d3   :  { %v628_v13 = vpop.xlane.xlu0 %627 }
0x13d4   :  { %v629_v14 = vsub.f32 %v623_v11, %v628_v13 }
0x13d6   :  { %v630_v15 = vmul.f32 1.442695, %v629_v14 }
0x13d8   :  { %791 = vpow2.f32 %v630_v15 }
0x13de   :  { %v792_v16 = vpop.eup %791 }
0x13df   :  { %v632_v17 = vsel %vm625_vm4, %v792_v16, 0.0 }
0x13e0   :  { %633 = vadd.xlane.f32.xlu1 %v632_v17 }
0x1453   :  { %v634_v18 = vpop.xlane.xlu1 %633 }
0x1454   :  { %793 = vlog2.f32 %v634_v18 }
0x145a   :  { %v794_v19 = vpop.eup %793 }
0x145b   :  { %v636_v20 = vmul.f32 0.6931472, %v794_v19 }
0x145d   :  { %v637_v21 = vadd.f32 %v636_v20, %v628_v13 }
0x145f   :  { %v638_v22 = vsub.f32 %v623_v11, %v637_v21 }
0x1461   :  { %639 = vxpose.xlu2.b32.start.end [1/1] (short) (narrow) %v638_v22, 8 }
0x14fa   :  { %v655_v24 = vpop.trf.xlu2 }
0x14fb   :  { %671 = vst.msk [vmem:[#allocation3] sm:$0xff] %vm625_vm4, %v655_v24 }
0x14fc   :  { %682 = dma.vmem_to_hbm [thread:$0]  %s678_s5, 128, %s680_s17, [#allocation4]  }
0x14fd   :  { %819 = dma.done.wait [#allocation4], 128  }
0x14fe   :  { %820 = vsyncadd [#allocation4], 4294967168 }
0x14ff   :  { %687 = vsyncpa [#allocation4], 1 }

</bundles_post_ra>
